<compile_context>
chip_gen: v7x
topology: tpu7x:2x2x1
jax: 0.10.0
libtpu: 0.0.40
codegen_flags: <defaults>
</compile_context>

<pallas_src>
import functools
from typing import List, Tuple

import jax
import jax.numpy as jnp
from jax.experimental import pallas as pl
from jax.experimental.pallas import tpu as pltpu


def _round_up(x: int, m: int) -> int:
    return (x + m - 1) // m * m


def _largest_divisor_tile(padded: int, unit: int, max_units: int) -> int:
    """Largest multiple of `unit` dividing `padded`, capped at max_units*unit."""
    m = padded // unit
    best = 1
    for d in range(1, min(m, max_units) + 1):
        if m % d == 0:
            best = d
    return best * unit


def _recon_head_kernel(x_ref, w_ref, b_ref, o_ref, acc_ref):
    k = pl.program_id(2)

    @pl.when(k == 0)
    def _():
        acc_ref[...] = jnp.zeros_like(acc_ref)

    # MXU matmul: bf16 operands (x cast in-kernel after the block load),
    # explicit f32 accumulation.
    acc_ref[...] += jnp.dot(
        x_ref[...].astype(w_ref.dtype), w_ref[...],
        preferred_element_type=jnp.float32,
    )

    @pl.when(k == pl.num_programs(2) - 1)
    def _():
        o_ref[...] = (acc_ref[...] + b_ref[...]).astype(o_ref.dtype)


@functools.partial(jax.jit, static_argnames=("cat_cardinality", "num_continuous"))
def reconstruction_head_forward(
    x: jax.Array,          # (B, D) float32 activations
    w_fused: jax.Array,    # (D_pad, N_pad) bf16, fused + lane-padded weights
    b_fused: jax.Array,    # (1, N_pad)     f32,  fused + lane-padded bias
    cat_cardinality: Tuple[int, ...],
    num_continuous: int,
):
    B, D = x.shape
    D_pad, N_pad = w_fused.shape
    total_out = sum(cat_cardinality) + num_continuous

    # --- tiling -------------------------------------------------------------
    B8 = _round_up(max(B, 1), 8)
    if B8 <= 512:
        TB = B8                                   # zero batch padding
    else:
        TB = min((512, 256, 128), key=lambda t: (_round_up(B8, t), -t))
    B_pad = _round_up(B8, TB)
    TN = _largest_divisor_tile(N_pad, 128, 8)     # <= 1024, divides N_pad
    TK = _largest_divisor_tile(D_pad, 128, 16)    # <= 2048, divides D_pad
    grid = (N_pad // TN, B_pad // TB, D_pad // TK)

    # --- pad x only when needed (kept f32; cast to bf16 inside the kernel) ---
    if B_pad != B or D_pad != D:
        x_p = jnp.pad(x, ((0, B_pad - B), (0, D_pad - D)))
    else:
        x_p = x

    # --- VMEM budget: double-buffered blocks + resident bias + accumulator ---
    vmem_bytes = (
        2 * (TB * TK * 4 + TK * TN * 2 + TB * TN * 4)
        + TN * 4
        + TB * TN * 4
    )
    vmem_limit = int(min(max(vmem_bytes + (2 << 20), 16 << 20), 48 << 20))

    flops = 2 * B_pad * D_pad * N_pad
    bytes_accessed = (
        B_pad * D_pad * 4 * (N_pad // TN)      # x streamed per feature tile
        + D_pad * N_pad * 2 * (B_pad // TB)    # W (resident across batch if 1 K block)
        + N_pad * 4
        + B_pad * N_pad * 4
    )

    out = pl.pallas_call(
        _recon_head_kernel,
        out_shape=jax.ShapeDtypeStruct((B_pad, N_pad), jnp.float32),
        grid_spec=pltpu.PrefetchScalarGridSpec(
            num_scalar_prefetch=0,
            grid=grid,
            in_specs=[
                pl.BlockSpec((TB, TK), lambda j, i, k: (i, k)),   # x: streamed
                pl.BlockSpec((TK, TN), lambda j, i, k: (k, j)),   # W: resident across i
                pl.BlockSpec((1, TN), lambda j, i, k: (0, j)),    # bias: resident
            ],
            out_specs=pl.BlockSpec((TB, TN), lambda j, i, k: (i, j)),
            scratch_shapes=[pltpu.VMEM((TB, TN), jnp.float32)],
        ),
        compiler_params=pltpu.CompilerParams(
            dimension_semantics=("parallel", "parallel", "arbitrary"),
            vmem_limit_bytes=vmem_limit,
        ),
        cost_estimate=pl.CostEstimate(
            flops=flops, transcendentals=0, bytes_accessed=bytes_accessed
        ),
    )(x_p, w_fused, b_fused)

    # Drop padding; split the fused slab back into per-head outputs
    # (PyTorch order: list of categorical heads, then the continuous head).
    # Zero-padded columns sit past `total_out`, so they are never exposed.
    out = out[:B]
    cat_preds = []
    off = 0
    for card in cat_cardinality:
        cat_preds.append(out[:, off:off + card])
        off += card
    cont_preds = out[:, off:off + num_continuous]
    return cat_preds, cont_preds


def init_params(key, input_dim: int, num_continuous: int,
                cat_cardinality: List[int], compute_dtype=jnp.bfloat16):
    """Deterministic nn.Linear-style init, fused + lane-padded + pre-cast bf16."""
    bound = 1.0 / (input_dim ** 0.5)
    weights, biases = [], []
    out_dims = list(cat_cardinality) + [num_continuous]
    for i, out_dim in enumerate(out_dims):
        kw, kb = jax.random.split(jax.random.fold_in(key, i))
        # PyTorch Linear weight is (out, in); stored transposed as (in, out).
        w = jax.random.uniform(kw, (input_dim, out_dim), jnp.float32, -bound, bound)
        b = jax.random.uniform(kb, (out_dim,), jnp.float32, -bound, bound)
        weights.append(w)
        biases.append(b)

    w_fused = jnp.concatenate(weights, axis=1)          # (D, total_out)
    b_fused = jnp.concatenate(biases, axis=0)           # (total_out,)

    D, total_out = w_fused.shape
    D_pad = _round_up(D, 128)
    N_pad = _round_up(total_out, 128)
    w_fused = jnp.pad(w_fused, ((0, D_pad - D), (0, N_pad - total_out)))
    b_fused = jnp.pad(b_fused, (0, N_pad - total_out))[None, :]
    # Weights pre-cast to the MXU compute dtype once, at init time.
    return w_fused.astype(compute_dtype), b_fused.astype(jnp.float32)


def reference_forward(x, w_fused, b_fused, cat_cardinality, num_continuous):
    """Plain-JAX reference with the same bf16-operand / f32-accum numerics."""
    D = x.shape[1]
    total_out = sum(cat_cardinality) + num_continuous
    w = w_fused[:D, :total_out]
    b = b_fused[:, :total_out]
    out = jnp.dot(x.astype(w.dtype), w, preferred_element_type=jnp.float32) + b
    cat_preds, off = [], 0
    for card in cat_cardinality:
        cat_preds.append(out[:, off:off + card])
        off += card
    return cat_preds, out[:, off:off + num_continuous]


if __name__ == "__main__":
    input_dim = 32
    num_continuous = 4
    cat_cardinality = (3, 5, 7)
    batch = 8

    key = jax.random.PRNGKey(0)
    kx, kp = jax.random.split(key)
    x = jax.random.normal(kx, (batch, input_dim), jnp.float32)
    w_fused, b_fused = init_params(kp, input_dim, num_continuous, list(cat_cardinality))

    cat_preds, cont_preds = reconstruction_head_forward(
        x, w_fused, b_fused, cat_cardinality, num_continuous
    )
    jax.block_until_ready(cont_preds)
    for c in cat_preds:
        jax.block_until_ready(c)

    # Correctness vs plain-JAX reference (same bf16/f32 numerics).
    ref_cat, ref_cont = reference_forward(
        x, w_fused, b_fused, cat_cardinality, num_continuous
    )
    assert all(
        jnp.allclose(a, b, atol=1e-3, rtol=1e-3) for a, b in zip(cat_preds, ref_cat)
    )
    assert jnp.allclose(cont_preds, ref_cont, atol=1e-3, rtol=1e-3)
    assert [c.shape for c in cat_preds] == [(batch, card) for card in cat_cardinality]
    assert cont_preds.shape == (batch, num_continuous)

    print("KERNEL_OK")
</pallas_src>

<mosaic_0001>
module attributes {stable_mosaic.version = 11 : i64} {
  func.func @_recon_head_kernel(%arg0: i32, %arg1: i32, %arg2: i32, %arg3: memref<8x128xf32, #tpu.memory_space<vmem>>, %arg4: memref<128x128xbf16, #tpu.memory_space<vmem>>, %arg5: memref<1x128xf32, #tpu.memory_space<vmem>>, %arg6: memref<8x128xf32, #tpu.memory_space<vmem>>, %arg7: memref<8x128xf32, #tpu.memory_space<vmem>>) attributes {dimension_semantics = [#tpu.dimension_semantics<parallel>, #tpu.dimension_semantics<parallel>, #tpu.dimension_semantics<arbitrary>], iteration_bounds = array<i64: 1, 1, 1>, scalar_prefetch = 0 : i64, scratch_operands = 1 : i64, tpu.core_type = #tpu.core_type<tc>, window_params = [{transform_indices = @transform_0, window_bounds = array<i64: 8, 128>}, {transform_indices = @transform_1, window_bounds = array<i64: 128, 128>}, {transform_indices = @transform_2, window_bounds = array<i64: 1, 128>}, {transform_indices = @transform_3, window_bounds = array<i64: 8, 128>}]} {
    %c0_i32 = arith.constant 0 : i32
    %0 = arith.cmpi eq, %arg2, %c0_i32 : i32
    %1 = arith.extui %0 : i1 to i32
    %c0_i32_0 = arith.constant 0 : i32
    %2 = arith.cmpi ne, %1, %c0_i32_0 : i32
    scf.if %2 {
      %cst_10 = arith.constant 0.000000e+00 : f32
      %13 = vector.broadcast %cst_10 : f32 to vector<8x128xf32>
      %c0_11 = arith.constant 0 : index
      %c0_12 = arith.constant 0 : index
      %14 = vector.load %arg7[%c0_11, %c0_12] : memref<8x128xf32, #tpu.memory_space<vmem>>, vector<8x128xf32>
      tpu.vector_store %arg7[%c0_11, %c0_12], %13 {strides = array<i32>} : memref<8x128xf32, #tpu.memory_space<vmem>>, vector<8x128xf32>,
    } else {
    }
    %c0 = arith.constant 0 : index
    %c0_1 = arith.constant 0 : index
    %3 = vector.load %arg7[%c0, %c0_1] : memref<8x128xf32, #tpu.memory_space<vmem>>, vector<8x128xf32>
    %c0_2 = arith.constant 0 : index
    %c0_3 = arith.constant 0 : index
    %4 = vector.load %arg3[%c0_2, %c0_3] : memref<8x128xf32, #tpu.memory_space<vmem>>, vector<8x128xf32>
    %5 = arith.truncf %4 : vector<8x128xf32> to vector<8x128xbf16>
    %c0_4 = arith.constant 0 : index
    %c0_5 = arith.constant 0 : index
    %6 = vector.load %arg4[%c0_4, %c0_5] : memref<128x128xbf16, #tpu.memory_space<vmem>>, vector<128x128xbf16>
    %cst = arith.constant dense<0.000000e+00> : vector<8x128xf32>
    %7 = tpu.matmul %5, %6, %cst {dimension_numbers = #tpu.dot_dimension_numbers<[1], [0], [0], [1], [0, 0, 1, 1], [], []>} : vector<8x128xbf16>, vector<128x128xbf16>, vector<8x128xf32> -> vector<8x128xf32>
    %8 = arith.addf %3, %7 : vector<8x128xf32>
    %c0_6 = arith.constant 0 : index
    %c0_7 = arith.constant 0 : index
    %9 = vector.load %arg7[%c0_6, %c0_7] : memref<8x128xf32, #tpu.memory_space<vmem>>, vector<8x128xf32>
    tpu.vector_store %arg7[%c0_6, %c0_7], %8 {strides = array<i32>} : memref<8x128xf32, #tpu.memory_space<vmem>>, vector<8x128xf32>,
    %c0_i32_8 = arith.constant 0 : i32
    %10 = arith.cmpi eq, %arg2, %c0_i32_8 : i32
    %11 = arith.extui %10 : i1 to i32
    %c0_i32_9 = arith.constant 0 : i32
    %12 = arith.cmpi ne, %11, %c0_i32_9 : i32
    scf.if %12 {
      %c0_10 = arith.constant 0 : index
      %c0_11 = arith.constant 0 : index
      %13 = vector.load %arg7[%c0_10, %c0_11] : memref<8x128xf32, #tpu.memory_space<vmem>>, vector<8x128xf32>
      %c0_12 = arith.constant 0 : index
      %c0_13 = arith.constant 0 : index
      %14 = vector.load %arg5[%c0_12, %c0_13] : memref<1x128xf32, #tpu.memory_space<vmem>>, vector<1x128xf32>
      %15 = vector.broadcast %14 : vector<1x128xf32> to vector<8x128xf32>
      %16 = arith.addf %13, %15 : vector<8x128xf32>
      %c0_14 = arith.constant 0 : index
      %c0_15 = arith.constant 0 : index
      %17 = vector.load %arg6[%c0_14, %c0_15] : memref<8x128xf32, #tpu.memory_space<vmem>>, vector<8x128xf32>
      tpu.vector_store %arg6[%c0_14, %c0_15], %16 {strides = array<i32>} : memref<8x128xf32, #tpu.memory_space<vmem>>, vector<8x128xf32>,
    } else {
    }
    return
  }
  func.func @transform_0(%arg0: i32, %arg1: i32, %arg2: i32) -> (i32, i32) {
    %c0_i32 = arith.constant 0 : i32
    return %arg1, %arg2 : i32, i32
  }
  func.func @transform_1(%arg0: i32, %arg1: i32, %arg2: i32) -> (i32, i32) {
    %c0_i32 = arith.constant 0 : i32
    return %arg2, %arg0 : i32, i32
  }
  func.func @transform_2(%arg0: i32, %arg1: i32, %arg2: i32) -> (i32, i32) {
    %c0_i32 = arith.constant 0 : i32
    %c0_i32_0 = arith.constant 0 : i32
    return %c0_i32, %arg0 : i32, i32
  }
  func.func @transform_3(%arg0: i32, %arg1: i32, %arg2: i32) -> (i32, i32) {
    %c0_i32 = arith.constant 0 : i32
    return %arg1, %arg0 : i32, i32
  }
}

</mosaic_0001>

<bundles_post_ra>
// kernel: reconstruction_head_forward.1
= control target key start
LH: loop header
LB: loop body
LE: loop exit
PB: predicated region body
PF: predicated region fallthrough
CT: control target
= control target key end

     0   :  { %8 = vsyncpa [#allocation4], 0  ;;  %s236_s12 = smov [#allocation3]   ;;  %s282_s0 = inlined_call_operand.vmem [shape: f32[8,128], index: 0, kind: input, shape index: {}]   ;;  %s283_s1 = inlined_call_operand.hbm [shape: bf16[128,128], index: 1, kind: input, shape index: {}]   ;;  %s284_s2 = inlined_call_operand.vmem [shape: f32[1,128], index: 2, kind: input, shape index: {}]   ;;  %s285_s3 = inlined_call_operand.vmem [shape: f32[8,128], index: 3, kind: output, shape index: {}]  }
   0x1   :  { %s16_s13 = sshll.u32 %s236_s12, 4  ;;  %s212_s16 = scalar_lea.hbm %s283_s1, 1024  ;;  %s17_s13 = int_to_ptr.vmem [resolvable:$true] %s16_s13 }
   0x2   :  { %p213_p0 = scmp.ne.s32.totalorder %s283_s1, %s212_s16  ;;  %p216_p1 = scmp.lt.u32.totalorder %s212_s16, %s283_s1 }
   0x4   :  { %p218_p2 = pnand %p216_p1, %p213_p0 }
   0x6   :  { %221 = shalt.err (!%p218_p2)
}
   0x7   :  { %s222_s21 = scalar_lea.vmem %s17_s13, 1024  ;;  %p227_p4 = scmp.lt.s32.totalorder %s17_s13, %s17_s13 }
   0x8   :  { %p223_p3 = scmp.ne.s32.totalorder %s17_s13, %s222_s21  ;;  %p228_p5 = scmp.lt.s32.totalorder %s222_s21, %s222_s21 }
   0xa   :  { %p229_p6 = por %p228_p5, %p227_p4 }
   0xc   :  { %p230_p7 = pnand %p229_p6, %p223_p3 }
   0xe   :  { %233 = shalt.err (!%p230_p7)
}
   0xf   :  { %s237_s22 = smov 64   ;;  %s238_s23 = smov 4  }
  0x10   :  { %22 = dma.hbm_to_vmem [thread:$0]  %s283_s1, 1024, %s17_s13, [#allocation4], %s237_s22, %s237_s22, %s238_s23  }
  0x11   :  { %234 = dma.done.wait [#allocation4], 1024  }
  0x12   :  { %235 = vsyncadd [#allocation4], 4294966272  ;;  %v239_v0 = vmov 0.0   ;;  %vm240_vm0 = vmmov 0   ;;  %v204_v1 = vld [vmem:[#allocation3] sm:$0xff]   ;;  %v205_v2 = vld [vmem:[#allocation3 + $0x8] sm:$0xff]  }
  0x13   :  { %179 = vmatprep.subr.bf16.mxu0 %v239_v0  ;;  %195 = vmatprep.mubr.msk.bf16.mxu0 %vm240_vm0, %v239_v0  ;;  %v206_v3 = vld [vmem:[#allocation3 + $0x10] sm:$0xff]   ;;  %v207_v4 = vld [vmem:[#allocation3 + $0x18] sm:$0xff]   ;;  %v208_v5 = vld [vmem:[#allocation3 + $0x20] sm:$0xff]  }
  0x14   :  { %180 = vmatpush3.bf16.msra.mxu0 %v204_v1  ;;  %v209_v6 = vld [vmem:[#allocation3 + $0x28] sm:$0xff]   ;;  %v210_v7 = vld [vmem:[#allocation3 + $0x30] sm:$0xff]   ;;  %v211_v8 = vld [vmem:[#allocation3 + $0x38] sm:$0xff]  }
  0x15   :  { %181 = vmatprep.subr.bf16.mxu0 %v239_v0  ;;  %v35_v9 = vld [vmem:[%s282_s0] sm:$0xff] }
  0x16   :  { %v36_v10 = vpack.c.bf16 %v35_v9, %v35_v9  ;;  %v169_v11 = vld [vmem:[%s284_s2] ss:$0 sm:$0xff] }
  0x18   :  { %182 = vmatpush3.bf16.msra.mxu0 %v205_v2 }
  0x19   :  { %183 = vmatprep.subr.bf16.mxu0 %v239_v0 }
  0x1c   :  { %184 = vmatpush3.bf16.msra.mxu0 %v206_v3 }
  0x1d   :  { %185 = vmatprep.subr.bf16.mxu0 %v239_v0 }
  0x20   :  { %186 = vmatpush3.bf16.msra.mxu0 %v207_v4 }
  0x21   :  { %187 = vmatprep.subr.bf16.mxu0 %v239_v0 }
  0x24   :  { %188 = vmatpush3.bf16.msra.mxu0 %v208_v5 }
  0x25   :  { %189 = vmatprep.subr.bf16.mxu0 %v239_v0 }
  0x28   :  { %190 = vmatpush3.bf16.msra.mxu0 %v209_v6 }
  0x29   :  { %191 = vmatprep.subr.bf16.mxu0 %v239_v0 }
  0x2c   :  { %192 = vmatpush3.bf16.msra.mxu0 %v210_v7 }
  0x2d   :  { %193 = vmatprep.subr.bf16.mxu0 %v239_v0 }
  0x30   :  { %194 = vmatpush3.bf16.msra.mxu0 %v211_v8 }
  0x33   :  { %196 = vmatmul.mubr.bf16.vlgmr.msra.gmra.mrb[0].mxu0 %v36_v10 }
 0x106   :  { %v135_v12 = vpop.f32.mrb[0].mxu0 }
 0x107   :  { %v154_v13 = vadd.f32 %v169_v11, %v135_v12  ;;  %v197_v14 = vpop.f32.mrb[1].mxu0 }
 0x108   :  { %v138_v15 = vpop.f32.mrb[2].mxu0 }
 0x109   :  { %155 = vst [vmem:[%s285_s3] sm:$0xff] %v154_v13  ;;  %v198_v16 = vpop.f32.mrb[3].mxu0 }
 0x10a   :  { %160 = vsyncpa [#allocation4], 1 }

</bundles_post_ra>
